<compile_context>
chip_gen: v7x
topology: tpu7x:2x2x1
jax: 0.10.0
libtpu: 0.0.40
codegen_flags: <defaults>
</compile_context>

<pallas_src>
import jax
import jax.numpy as jnp
from jax.experimental import pallas as pl
from jax.experimental.pallas import tpu as pltpu


def rgcn_kernel(x_ref, w_ref, rel_ref, b_ref, adj_ref, out_ref, out1_ref):
    # x_ref   : (R, 1, F) f32      resident across the node grid
    # w_ref   : (R, F, K) f32      resident
    # rel_ref : (R, J, K) f32      resident
    # b_ref   : (1, J)    f32      resident
    # adj_ref : (TILE_N, R)        streamed (bf16 or f32)
    # out_ref : (TILE_N, J) f32    streamed
    # out1_ref: (R, J)    f32      VMEM scratch, persists across grid steps

    @pl.when(pl.program_id(0) == 0)
    def _():
        # support[r, 0, k] = sum_f x[r, 0, f] * w[r, f, k]   (batched MXU matmul)
        support = jax.lax.dot_general(
            x_ref[...], w_ref[...],
            dimension_numbers=(((2,), (1,)), ((0,), (0,))),
            preferred_element_type=jnp.float32)              # (R, 1, K)
        # out1[r, 0, j] = sum_k support[r, 0, k] * rel[r, j, k]  (batched MXU)
        out1 = jax.lax.dot_general(
            support, rel_ref[...],
            dimension_numbers=(((2,), (2,)), ((0,), (0,))),
            preferred_element_type=jnp.float32)              # (R, 1, J)
        r, j = out1_ref.shape
        out1_ref[...] = out1.reshape(r, j)                   # drop unit dim

    # out[n, j] = sum_r adj[n, r] * out1[r, j] + bias[j]     (MXU matmul)
    adj = adj_ref[...].astype(jnp.float32)                   # exact for 0/1 bf16
    acc = jnp.dot(adj, out1_ref[...], preferred_element_type=jnp.float32)
    out_ref[...] = acc + b_ref[...]


def rgcn_forward(x, weights, rel_matrix, adjacency, bias=None, *,
                 tile_n=None, cast_adj_bf16=True):
    R, F = x.shape
    Rw, Fw, K = weights.shape
    Rr, J, Kr = rel_matrix.shape
    N, Ra = adjacency.shape
    assert (Rw, Fw) == (R, F) and Rr == R and Ra == R and Kr == K
    # The torch module's `output += bias` broadcast requires J == K.
    assert J == K, "rel_matrix dim 1 must equal out_features (bias broadcast)"

    if bias is None:
        bias = jnp.zeros((K,), dtype=jnp.float32)

    x3 = x.astype(jnp.float32).reshape(R, 1, F)   # (1, F) per relation -> MXU lhs
    w = weights.astype(jnp.float32)
    rel = rel_matrix.astype(jnp.float32)
    b2 = bias.astype(jnp.float32).reshape(1, J)
    # bf16 is exact for 0/1 adjacencies and halves the dominant DMA stream.
    # Use cast_adj_bf16=False for weighted adjacencies needing full f32.
    adj = adjacency.astype(jnp.bfloat16 if cast_adj_bf16 else jnp.float32)

    # Node tile: biggest that fits next to the resident operands while leaving
    # room for double-buffered adj/out tiles (budget sized for v7x's 64 MiB).
    if tile_n is None:
        if N <= 512:
            tile_n = N
        else:
            resident = 4 * (w.size + rel.size + x3.size) + 4 * R * J
            budget = max((40 << 20) - resident, 4 << 20)
            per_row = 2 * (R * adj.dtype.itemsize + 4 * J)   # 2x: double buffer
            tile_n = int(min(2048, max(64, budget // per_row)))
            tile_n = max(16, (tile_n // 16) * 16)            # bf16 sublane align
    grid_n = pl.cdiv(N, tile_n)

    return pl.pallas_call(
        rgcn_kernel,
        out_shape=jax.ShapeDtypeStruct((N, J), jnp.float32),
        grid=(grid_n,),
        in_specs=[
            pl.BlockSpec((R, 1, F), lambda i: (0, 0, 0)),    # x        (resident)
            pl.BlockSpec((R, F, K), lambda i: (0, 0, 0)),    # weights  (resident)
            pl.BlockSpec((R, J, K), lambda i: (0, 0, 0)),    # rel      (resident)
            pl.BlockSpec((1, J), lambda i: (0, 0)),          # bias     (resident)
            pl.BlockSpec((tile_n, R), lambda i: (i, 0)),     # adjacency (streamed)
        ],
        out_specs=pl.BlockSpec((tile_n, J), lambda i: (i, 0)),
        scratch_shapes=[pltpu.VMEM((R, J), jnp.float32)],
        compiler_params=pltpu.CompilerParams(
            # Scratch is initialized at grid step 0 and reused by later steps,
            # so the node axis must stay "arbitrary" (a megacore "parallel"
            # split would leave core 1's scratch uninitialized on v7x).
            dimension_semantics=("arbitrary",),
            vmem_limit_bytes=48 << 20,
        ),
    )(x3, w, rel, b2, adj)


def rgcn_reference(x, weights, rel_matrix, adjacency, bias):
    support = jnp.einsum('ij,ijk->ik', x, weights)
    out = jnp.einsum('ijk,ik->ij', rel_matrix, support)
    out = adjacency @ out
    return out + bias


if __name__ == "__main__":
    # Small, module-consistent shapes.
    num_rels, in_features, out_features, num_nodes = 8, 32, 32, 64

    key = jax.random.PRNGKey(0)
    k_x, k_w, k_rel, k_adj = jax.random.split(key, 4)

    # xavier_uniform_ on (num_rels, in, out): fan_in = in*out, fan_out = num_rels*out.
    fan_in = in_features * out_features
    fan_out = num_rels * out_features
    bound = (6.0 / (fan_in + fan_out)) ** 0.5
    weights = jax.random.uniform(
        k_w, (num_rels, in_features, out_features),
        minval=-bound, maxval=bound, dtype=jnp.float32)
    bias = jnp.zeros((out_features,), dtype=jnp.float32)

    x = jax.random.normal(k_x, (num_rels, in_features), dtype=jnp.float32)
    rel_matrix = jax.random.normal(
        k_rel, (num_rels, out_features, out_features), dtype=jnp.float32)
    adjacency = (jax.random.uniform(k_adj, (num_nodes, num_rels)) > 0.5
                 ).astype(jnp.float32)

    # tile_n=16 exercises the node grid, pipelining and scratch reuse even at
    # this tiny size (4 grid steps).
    out = rgcn_forward(x, weights, rel_matrix, adjacency, bias, tile_n=16)
    out = jax.block_until_ready(out)

    ref = rgcn_reference(x, weights, rel_matrix, adjacency, bias)
    assert out.shape == (num_nodes, out_features)
    # MXU f32 matmuls may use reduced-precision passes at default precision,
    # so compare with a tolerance that covers bf16-pass rounding.
    assert jnp.allclose(out, ref, atol=1e-2, rtol=1e-2), "mismatch vs reference"

    print("KERNEL_OK")
</pallas_src>

<mosaic_0001>
module attributes {stable_mosaic.version = 11 : i64} {
  func.func @rgcn_kernel(%arg0: i32, %arg1: memref<8x1x32xf32, #tpu.memory_space<vmem>>, %arg2: memref<8x32x32xf32, #tpu.memory_space<vmem>>, %arg3: memref<8x32x32xf32, #tpu.memory_space<vmem>>, %arg4: memref<1x32xf32, #tpu.memory_space<vmem>>, %arg5: memref<16x8xbf16, #tpu.memory_space<vmem>>, %arg6: memref<16x32xf32, #tpu.memory_space<vmem>>, %arg7: memref<8x32xf32, #tpu.memory_space<vmem>>) attributes {dimension_semantics = [#tpu.dimension_semantics<arbitrary>], iteration_bounds = array<i64: 4>, scalar_prefetch = 0 : i64, scratch_operands = 1 : i64, tpu.core_type = #tpu.core_type<tc>, window_params = [{pipeline_mode = #tpu.pipeline_mode<synchronous>, transform_indices = @transform_0, window_bounds = array<i64: 8, 1, 32>}, {pipeline_mode = #tpu.pipeline_mode<synchronous>, transform_indices = @transform_1, window_bounds = array<i64: 8, 32, 32>}, {pipeline_mode = #tpu.pipeline_mode<synchronous>, transform_indices = @transform_2, window_bounds = array<i64: 8, 32, 32>}, {pipeline_mode = #tpu.pipeline_mode<synchronous>, transform_indices = @transform_3, window_bounds = array<i64: 1, 32>}, {transform_indices = @transform_4, window_bounds = array<i64: 16, 8>}, {transform_indices = @transform_5, window_bounds = array<i64: 16, 32>}]} {
    %c0_i32 = arith.constant 0 : i32
    %0 = arith.cmpi eq, %arg0, %c0_i32 : i32
    %1 = arith.extui %0 : i1 to i32
    %c0_i32_0 = arith.constant 0 : i32
    %2 = arith.cmpi ne, %1, %c0_i32_0 : i32
    scf.if %2 {
      %c0_8 = arith.constant 0 : index
      %c0_9 = arith.constant 0 : index
      %c0_10 = arith.constant 0 : index
      %11 = vector.load %arg1[%c0_8, %c0_9, %c0_10] : memref<8x1x32xf32, #tpu.memory_space<vmem>>, vector<8x1x32xf32>
      %c0_11 = arith.constant 0 : index
      %c0_12 = arith.constant 0 : index
      %c0_13 = arith.constant 0 : index
      %12 = vector.load %arg2[%c0_11, %c0_12, %c0_13] : memref<8x32x32xf32, #tpu.memory_space<vmem>>, vector<8x32x32xf32>
      %cst_14 = arith.constant dense<0.000000e+00> : vector<8x1x32xf32>
      %13 = tpu.matmul %11, %12, %cst_14 {dimension_numbers = #tpu.dot_dimension_numbers<[2], [1], [1], [2], [0, 0, 0, 1, 1, 2], [0], [0]>} : vector<8x1x32xf32>, vector<8x32x32xf32>, vector<8x1x32xf32> -> vector<8x1x32xf32>
      %c0_15 = arith.constant 0 : index
      %c0_16 = arith.constant 0 : index
      %c0_17 = arith.constant 0 : index
      %14 = vector.load %arg3[%c0_15, %c0_16, %c0_17] : memref<8x32x32xf32, #tpu.memory_space<vmem>>, vector<8x32x32xf32>
      %cst_18 = arith.constant dense<0.000000e+00> : vector<8x1x32xf32>
      %15 = tpu.matmul %13, %14, %cst_18 {dimension_numbers = #tpu.dot_dimension_numbers<[2], [2], [1], [1], [0, 0, 0, 1, 1, 1], [0], [0]>} : vector<8x1x32xf32>, vector<8x32x32xf32>, vector<8x1x32xf32> -> vector<8x1x32xf32>
      %16 = vector.shape_cast %15 : vector<8x1x32xf32> to vector<8x32xf32>
      %c0_19 = arith.constant 0 : index
      %c0_20 = arith.constant 0 : index
      %17 = vector.load %arg7[%c0_19, %c0_20] : memref<8x32xf32, #tpu.memory_space<vmem>>, vector<8x32xf32>
      tpu.vector_store %arg7[%c0_19, %c0_20], %16 {strides = array<i32>} : memref<8x32xf32, #tpu.memory_space<vmem>>, vector<8x32xf32>,
    } else {
    }
    %c0 = arith.constant 0 : index
    %c0_1 = arith.constant 0 : index
    %3 = vector.load %arg5[%c0, %c0_1] : memref<16x8xbf16, #tpu.memory_space<vmem>>, vector<16x8xbf16>
    %4 = arith.extf %3 : vector<16x8xbf16> to vector<16x8xf32>
    %c0_2 = arith.constant 0 : index
    %c0_3 = arith.constant 0 : index
    %5 = vector.load %arg7[%c0_2, %c0_3] : memref<8x32xf32, #tpu.memory_space<vmem>>, vector<8x32xf32>
    %cst = arith.constant dense<0.000000e+00> : vector<16x32xf32>
    %6 = tpu.matmul %4, %5, %cst {dimension_numbers = #tpu.dot_dimension_numbers<[1], [0], [0], [1], [0, 0, 1, 1], [], []>} : vector<16x8xf32>, vector<8x32xf32>, vector<16x32xf32> -> vector<16x32xf32>
    %c0_4 = arith.constant 0 : index
    %c0_5 = arith.constant 0 : index
    %7 = vector.load %arg4[%c0_4, %c0_5] : memref<1x32xf32, #tpu.memory_space<vmem>>, vector<1x32xf32>
    %8 = vector.broadcast %7 : vector<1x32xf32> to vector<16x32xf32>
    %9 = arith.addf %6, %8 : vector<16x32xf32>
    %c0_6 = arith.constant 0 : index
    %c0_7 = arith.constant 0 : index
    %10 = vector.load %arg6[%c0_6, %c0_7] : memref<16x32xf32, #tpu.memory_space<vmem>>, vector<16x32xf32>
    tpu.vector_store %arg6[%c0_6, %c0_7], %9 {strides = array<i32>} : memref<16x32xf32, #tpu.memory_space<vmem>>, vector<16x32xf32>,
    return
  }
  func.func @transform_0(%arg0: i32) -> (i32, i32, i32) {
    %c0_i32 = arith.constant 0 : i32
    %c0_i32_0 = arith.constant 0 : i32
    %c0_i32_1 = arith.constant 0 : i32
    %c0_i32_2 = arith.constant 0 : i32
    return %c0_i32, %c0_i32_0, %c0_i32_1 : i32, i32, i32
  }
  func.func @transform_1(%arg0: i32) -> (i32, i32, i32) {
    %c0_i32 = arith.constant 0 : i32
    %c0_i32_0 = arith.constant 0 : i32
    %c0_i32_1 = arith.constant 0 : i32
    %c0_i32_2 = arith.constant 0 : i32
    return %c0_i32, %c0_i32_0, %c0_i32_1 : i32, i32, i32
  }
  func.func @transform_2(%arg0: i32) -> (i32, i32, i32) {
    %c0_i32 = arith.constant 0 : i32
    %c0_i32_0 = arith.constant 0 : i32
    %c0_i32_1 = arith.constant 0 : i32
    %c0_i32_2 = arith.constant 0 : i32
    return %c0_i32, %c0_i32_0, %c0_i32_1 : i32, i32, i32
  }
  func.func @transform_3(%arg0: i32) -> (i32, i32) {
    %c0_i32 = arith.constant 0 : i32
    %c0_i32_0 = arith.constant 0 : i32
    %c0_i32_1 = arith.constant 0 : i32
    return %c0_i32, %c0_i32_0 : i32, i32
  }
  func.func @transform_4(%arg0: i32) -> (i32, i32) {
    %c0_i32 = arith.constant 0 : i32
    %c0_i32_0 = arith.constant 0 : i32
    return %arg0, %c0_i32 : i32, i32
  }
  func.func @transform_5(%arg0: i32) -> (i32, i32) {
    %c0_i32 = arith.constant 0 : i32
    %c0_i32_0 = arith.constant 0 : i32
    return %arg0, %c0_i32 : i32, i32
  }
}

</mosaic_0001>

<bundles_post_ra>
// kernel: tpu_custom_call.1
= control target key start
LH: loop header
LB: loop body
LE: loop exit
PB: predicated region body
PF: predicated region fallthrough
CT: control target
= control target key end

     0   :  { %10 = vsyncpa [#allocation4], 0  ;;  %s2643_s0 = inlined_call_operand.vmem [shape: f32[8,1,32], index: 0, kind: input, shape index: {}]   ;;  %s2644_s1 = inlined_call_operand.hbm [shape: f32[8,32,32], index: 1, kind: input, shape index: {}]   ;;  %s2645_s2 = inlined_call_operand.hbm [shape: f32[8,32,32], index: 2, kind: input, shape index: {}]   ;;  %s2646_s3 = inlined_call_operand.vmem [shape: f32[1,32], index: 3, kind: input, shape index: {}]   ;;  %s2647_s4 = inlined_call_operand.vmem [shape: bf16[64,8], index: 4, kind: input, shape index: {}]   ;;  %s2648_s5 = inlined_call_operand.vmem [shape: f32[64,32], index: 5, kind: output, shape index: {}]  }
   0x1   :  { %11 = vsyncpa [#allocation6], 0  ;;  %s2395_s18 = smov 0  }
   0x2 LB: > { %s2401_s19 = sadd.s32 4294967295, %s2356_s18   ;;  %p1807_p0 = scmp.ge.s32.totalorder %s2356_s18, 1  ;;  %s2356_s18 = sphi %s2395_s18, %s17_s18  }
   0x3   : > { %p158_p1 = scmp.lt.s32.totalorder %s2356_s18, 5  ;;  %s2358_s20 = smov [#allocation3]  }
   0x4   : > { %s173_s21 = sshll.u32 %s2358_s20, 4  ;;  %p2649_p4 = scmp.eq.s32.totalorder %s2401_s19, 0  ;;  %s174_s21 = int_to_ptr.vmem [resolvable:$true] %s173_s21 }
   0x5   : > { %p2406_p3 = pnand %p1807_p0, %p158_p1  ;;  %s2359_s23 = smov [#allocation5]  }
   0x6   : > { %s186_s24 = sshll.u32 %s2359_s23, 4  ;;  %s2286_s28 = scalar_lea.hbm %s2644_s1, 4096  ;;  %s2419_s24 = int_to_ptr.vmem [resolvable:$true] %s186_s24 }
   0x7   : > { %s2651_s22 = scalar_select %p2406_p3, 1, 0 }
   0x8   : > { %p2260_p5 = pneg %p2406_p3  ;;  %p2287_p7 = scmp.ne.s32.totalorder %s2644_s1, %s2286_s28 }
   0x9   : > { %p2293_p11 = scmp.lt.u32.totalorder %s2286_s28, %s2644_s1 }
   0xa   : > { %p2415_p6 = pnand %p2649_p4, %p2260_p5 }
   0xc   : > { %p2288_p8 = pneg %p2415_p6 }
   0xe   : > { %p2289_p9 = pnand %p2288_p8, %p2287_p7 }
  0x10   : > { %p2290_p10 = pneg %p2289_p9 }
  0x12   : > { %p2295_p12 = pnand %p2293_p11, %p2290_p10 }
  0x14   : > { %2298 = shalt.err (!%p2295_p12)
}
  0x15   : > { %s2299_s8 = scalar_lea.vmem %s174_s21, 4096  ;;  %p2307_p5 = scmp.lt.s32.totalorder %s174_s21, %s174_s21 }
  0x16   : > { %p2300_p13 = scmp.ne.s32.totalorder %s174_s21, %s2299_s8  ;;  %p2308_p2 = scmp.lt.s32.totalorder %s2299_s8, %s2299_s8 }
  0x18   : > { %p2302_p0 = pnand %p2300_p13, %p2288_p8  ;;  %p2309_p4 = por %p2308_p2, %p2307_p5 }
  0x1a   : > { %p2303_p1 = pneg %p2302_p0 }
  0x1c   : > { %p2310_p3 = pnand %p2309_p4, %p2303_p1 }
  0x1e   : > { %2313 = shalt.err (!%p2310_p3)
}
  0x1f   : > { %s2360_s9 = smov 128   ;;  %s2361_s10 = smov 8  }
  0x20   : > { %2263 = dma.hbm_to_vmem [thread:$0]  (!%p2415_p6), %s2644_s1, 4096, %s174_s21, [#allocation4], %s2360_s9, %s2360_s9, %s2361_s10  }
  0x21   : > { %s2314_s15 = scalar_lea.hbm %s2645_s2, 4096 }
  0x22   : > { %p2315_p7 = scmp.ne.s32.totalorder %s2645_s2, %s2314_s15  ;;  %p2321_p4 = scmp.lt.u32.totalorder %s2314_s15, %s2645_s2 }
  0x24   : > { %p2317_p2 = pnand %p2315_p7, %p2288_p8 }
  0x26   : > { %p2318_p3 = pneg %p2317_p2 }
  0x28   : > { %p2323_p9 = pnand %p2321_p4, %p2318_p3 }
  0x2a   : > { %2326 = shalt.err (!%p2323_p9)
}
  0x2b   : > { %s2327_s21 = scalar_lea.vmem %s2419_s24, 4096  ;;  %p2335_p13 = scmp.lt.s32.totalorder %s2419_s24, %s2419_s24 }
  0x2c   : > { %p2328_p10 = scmp.ne.s32.totalorder %s2419_s24, %s2327_s21  ;;  %p2336_p0 = scmp.lt.s32.totalorder %s2327_s21, %s2327_s21 }
  0x2e   : > { %p2330_p11 = pnand %p2328_p10, %p2288_p8  ;;  %p2337_p1 = por %p2336_p0, %p2335_p13 }
  0x30   : > { %p2331_p12 = pneg %p2330_p11 }
  0x32   : > { %p2338_p5 = pnand %p2337_p1, %p2331_p12 }
  0x34   : > { %2341 = shalt.err (!%p2338_p5)
}
  0x35   : > { %2266 = dma.hbm_to_vmem [thread:$0]  (!%p2415_p6), %s2645_s2, 4096, %s2419_s24, [#allocation6], %s2360_s9, %s2360_s9, %s2361_s10  }
  0x36   : > { %p2653_p7 = scmp.ne.s32.totalorder %s2651_s22, 0 }
  0x37   : > { %p2654_p2 = scmp.eq.s32.totalorder (!%p2653_p7), %s2401_s19, 0 }
  0x38   : > { %214 = sbr.rel (%p2653_p7) target bundleno = 780 (0x30c), region = 40 }
  0x3f   : > { %2347 = dma.done.wait (%p2654_p2), [#allocation4], 4096   ;;  %p2655_p8 = pmov %p2654_p2 }
  0x40   : > { %p2656_p3 = pmov %p2654_p2 }
  0x41   : > { %2349 = vsyncadd (%p2655_p8), [#allocation4], 4294963200 }
  0x42   : > { %2351 = dma.done.wait (%p2656_p3), [#allocation6], 4096   ;;  %p2657_p4 = pmov %p2654_p2 }
  0x43   : > { %s1814_s25 = sshll.u32 %s2401_s19, 1  ;;  %p2658_p6 = scmp.ne.s32.totalorder %s2401_s19, 0 }
  0x44   : > { %2353 = vsyncadd (%p2657_p4), [#allocation6], 4294963200  ;;  %p247_p9 = scmp.lt.s32.totalorder %s1814_s25, 7  ;;  %v270_v0 = vld [vmem:[#allocation3] sm:$0xff] (!%p2658_p6)  ;;  %v271_v1 = vld [vmem:[#allocation3 + $0x8] sm:$0xff] (!%p2658_p6)  ;;  %v2362_v3 = vmov (!%p2658_p6), 0.0|0.0  }
  0x45   : > { %261 = sbr.rel (%p2658_p6) target bundleno = 555 (0x22b), region = 52  ;;  %v274_v2 = vld [vmem:[#allocation3 + $0x20] sm:$0xff] (!%p2658_p6)  ;;  %2140 = vmatprep.subr.bf16.mxu0 (!%p2658_p6), %v2362_v3  ;;  %2146 = vmatprep.subr.bf16.mxu1 (!%p2658_p6), %v2362_v3  ;;  %v2141_v4 = vpack.c.bf16 (!%p2658_p6), %v271_v1, %v270_v0  ;;  %v275_v5 = vld [vmem:[#allocation3 + $0x28] sm:$0xff] (!%p2658_p6)  ;;  %v272_v6 = vld [vmem:[#allocation3 + $0x10] sm:$0xff] (!%p2658_p6)  ;;  %vm2363_vm0 = vmmov (!%p2658_p6), 0   ;;  %v2364_v11 = vmov (!%p2658_p6), 0.0  }
  0x46   : > { %s2662_s25 = smov (!%p247_p9, %s1814_s25), 7  ;;  %v273_v7 = vld [vmem:[#allocation3 + $0x18] sm:$0xff] (!%p2658_p6)  ;;  %v2147_v8 = vpack.c.bf16 (!%p2658_p6), %v275_v5, %v274_v2  ;;  %v276_v9 = vld [vmem:[#allocation3 + $0x30] sm:$0xff] (!%p2658_p6)  ;;  %1967 = vmatprep.mubr.msk.f32.mxu0 (!%p2658_p6), %vm2363_vm0, %v2364_v11  ;;  %1978 = vmatprep.mubr.msk.f32.mxu1 (!%p2658_p6), %vm2363_vm0, %v2364_v11  ;;  %v278_v14 = vld [vmem:[#allocation3 + $0x40] sm:$0xff] (!%p2658_p6)  ;;  %vm302_vm1 = vcmask (!%p2658_p6), 261120   ;;  %vm1608_vm3 = vcmask (!%p2658_p6), 1041409  }
  0x47   : > { %s1815_s24 = sshll.u32 %s2662_s25, 2  ;;  %s1817_s28 = sshll.u32 %s2662_s25, 3  ;;  %v277_v10 = vld [vmem:[#allocation3 + $0x38] sm:$0xff] (!%p2658_p6)  ;;  %2142 = vmatpush3.bf16.msra.mxu0 (!%p2658_p6), %v2141_v4  ;;  %v2144_v12 = vpack.c.bf16 (!%p2658_p6), %v273_v7, %v272_v6  ;;  %v279_v15 = vld [vmem:[#allocation3 + $0x48] sm:$0xff] (!%p2658_p6)  ;;  %v282_v16 = vld [vmem:[#allocation3 + $0x60] sm:$0xff] (!%p2658_p6)  ;;  %vm1611_vm4 = vcmask (!%p2658_p6), 1042434  }
  0x48   : > { %s2482_s30 = scalar_lea.vmem %s2647_s4, %s1815_s24  ;;  %s2487_s8 = scalar_lea.vmem %s2648_s5, %s1817_s28  ;;  %2148 = vmatpush3.bf16.msra.mxu1 (!%p2658_p6), %v2147_v8  ;;  %2143 = vmatprep.subr.bf16.mxu0 (!%p2658_p6), %v2362_v3  ;;  %v2150_v13 = vpack.c.bf16 (!%p2658_p6), %v277_v10, %v276_v9  ;;  %v283_v17 = vld [vmem:[#allocation3 + $0x68] sm:$0xff] (!%p2658_p6)  ;;  %v262_v18 = vld [vmem:[%s2643_s0] sm:$0x1] (!%p2658_p6)  ;;  %v2153_v19 = vpack.c.bf16 (!%p2658_p6), %v279_v15, %v278_v14  ;;  %v263_v20 = vld [vmem:[%s2643_s0 + $0x1] sm:$0x1] (!%p2658_p6)  ;;  %vm1614_vm5 = vcmask (!%p2658_p6), 1043459  }
  0x49   : > { %2149 = vmatprep.subr.bf16.mxu1 (!%p2658_p6), %v2362_v3  ;;  %v2159_v21 = vpack.c.bf16 (!%p2658_p6), %v283_v17, %v282_v16  ;;  %v280_v22 = vld [vmem:[#allocation3 + $0x50] sm:$0xff] (!%p2658_p6)  ;;  %v281_v23 = vld [vmem:[#allocation3 + $0x58] sm:$0xff] (!%p2658_p6)  ;;  %v286_v28 = vld [vmem:[#allocation3 + $0x80] sm:$0xff] (!%p2658_p6)  ;;  %vm1617_vm6 = vcmask (!%p2658_p6), 1044484   ;;  %vm1620_vm7 = vcmask (!%p2658_p6), 1045509   ;;  %vm1623_vm8 = vcmask (!%p2658_p6), 1046534  }
  0x4a   : > { %v284_v24 = vld [vmem:[#allocation3 + $0x70] sm:$0xff] (!%p2658_p6)  ;;  %v285_v25 = vld [vmem:[#allocation3 + $0x78] sm:$0xff] (!%p2658_p6)  ;;  %v2156_v26 = vpack.c.bf16 (!%p2658_p6), %v281_v23, %v280_v22  ;;  %v287_v29 = vld [vmem:[#allocation3 + $0x88] sm:$0xff] (!%p2658_p6)  ;;  %vm1626_vm9 = vcmask (!%p2658_p6), 1047559  }
  0x4b   : > { %2145 = vmatpush3.bf16.msra.mxu0 (!%p2658_p6), %v2144_v12  ;;  %v2162_v27 = vpack.c.bf16 (!%p2658_p6), %v285_v25, %v284_v24  ;;  %v290_v30 = vld [vmem:[#allocation3 + $0xa0] sm:$0xff] (!%p2658_p6)  ;;  %v291_v31 = vld [vmem:[#allocation3 + $0xa8] sm:$0xff] (!%p2658_p6)  ;;  %v264_v32 = vld [vmem:[%s2643_s0 + $0x2] sm:$0x1] (!%p2658_p6)  ;;  %v2165_v33 = vpack.c.bf16 (!%p2658_p6), %v287_v29, %v286_v28 }
  0x4c   : > { %2151 = vmatpush3.bf16.msra.mxu1 %v2150_v13  ;;  %2152 = vmatprep.subr.bf16.mxu0 %v2362_v3  ;;  %v265_v34 = vld [vmem:[%s2643_s0 + $0x3] sm:$0x1]  ;;  %v2171_v35 = vpack.c.bf16 %v291_v31, %v290_v30  ;;  %v288_v36 = vld [vmem:[#allocation3 + $0x90] sm:$0xff]  ;;  %v294_v42 = vld [vmem:[#allocation3 + $0xc0] sm:$0xff] }
  0x4d   : > { %2158 = vmatprep.subr.bf16.mxu1 %v2362_v3  ;;  %v289_v37 = vld [vmem:[#allocation3 + $0x98] sm:$0xff]  ;;  %v292_v38 = vld [vmem:[#allocation3 + $0xb0] sm:$0xff]  ;;  %v295_v43 = vld [vmem:[#allocation3 + $0xc8] sm:$0xff] }
  0x4e   : > { %1968 = vmatmul.mubr.msk.f32.vlgmr.msra.gmra.mrb[0].mxu0 %vm302_vm1, %v262_v18  ;;  %v293_v39 = vld [vmem:[#allocation3 + $0xb8] sm:$0xff]  ;;  %v2168_v40 = vpack.c.bf16 %v289_v37, %v288_v36  ;;  %v298_v44 = vld [vmem:[#allocation3 + $0xe0] sm:$0xff]  ;;  %v299_v45 = vld [vmem:[#allocation3 + $0xe8] sm:$0xff]  ;;  %v2177_v47 = vpack.c.bf16 %v295_v43, %v294_v42 }
  0x4f   : > { %1979 = vmatmul.mubr.msk.f32.vlgmr.msra.gmra.mrb[0].mxu1 %vm302_vm1, %v263_v20  ;;  %2154 = vmatpush3.bf16.msra.mxu0 %v2153_v19  ;;  %v2174_v41 = vpack.c.bf16 %v293_v39, %v292_v38  ;;  %v266_v46 = vld [vmem:[%s2643_s0 + $0x4] sm:$0x1]  ;;  %v267_v48 = vld [vmem:[%s2643_s0 + $0x5] sm:$0x1]  ;;  %v2183_v49 = vpack.c.bf16 %v299_v45, %v298_v44  ;;  %v296_v50 = vld [vmem:[#allocation3 + $0xd0] sm:$0xff] }
  0x50   : > { %2160 = vmatpush3.bf16.msra.mxu1 %v2159_v21  ;;  %2155 = vmatprep.subr.bf16.mxu0 %v2362_v3  ;;  %v297_v51 = vld [vmem:[#allocation3 + $0xd8] sm:$0xff]  ;;  %v300_v52 = vld [vmem:[#allocation3 + $0xf0] sm:$0xff]  ;;  %v887_v58 = vld [vmem:[#allocation5] sm:$0xff] }
  0x51   : > { %2161 = vmatprep.subr.bf16.mxu1 %v2362_v3  ;;  %1989 = vmatprep.mubr.msk.f32.mxu0 %vm2363_vm0, %v2364_v11  ;;  %v301_v53 = vld [vmem:[#allocation3 + $0xf8] sm:$0xff]  ;;  %v2180_v54 = vpack.c.bf16 %v297_v51, %v296_v50  ;;  %v888_v59 = vld [vmem:[#allocation5 + $0x8] sm:$0xff]  ;;  %v891_v60 = vld [vmem:[#allocation5 + $0x20] sm:$0xff] }
  0x52   : > { %2000 = vmatprep.mubr.msk.f32.mxu1 %vm2363_vm0, %v2364_v11  ;;  %v2186_v55 = vpack.c.bf16 %v301_v53, %v300_v52  ;;  %v268_v56 = vld [vmem:[%s2643_s0 + $0x6] sm:$0x1]  ;;  %v269_v57 = vld [vmem:[%s2643_s0 + $0x7] sm:$0x1]  ;;  %v892_v61 = vld [vmem:[#allocation5 + $0x28] sm:$0xff]  ;;  %v2189_v62 = vpack.c.bf16 %v888_v59, %v887_v58 }
  0x53   : > { %2157 = vmatpush3.bf16.msra.mxu0 %v2156_v26  ;;  %vm2563_vm2 = vmpackc.low %vm302_vm1, %vm302_vm1  ;;  %v2197_v0 = vpack.c.bf16 %v892_v61, %v891_v60  ;;  %v889_v1 = vld [vmem:[#allocation5 + $0x10] sm:$0xff]  ;;  %v890_v2 = vld [vmem:[#allocation5 + $0x18] sm:$0xff] }
  0x54   : > { %2163 = vmatpush3.bf16.msra.mxu1 %v2162_v27  ;;  %2164 = vmatprep.subr.bf16.mxu0 %v2362_v3  ;;  %v893_v4 = vld [vmem:[#allocation5 + $0x30] sm:$0xff]  ;;  %v894_v5 = vld [vmem:[#allocation5 + $0x38] sm:$0xff]  ;;  %v2193_v6 = vpack.c.bf16 %v890_v2, %v889_v1  ;;  %v895_v8 = vld [vmem:[#allocation5 + $0x40] sm:$0xff] }
  0x55   : > { %2170 = vmatprep.subr.bf16.mxu1 %v2362_v3  ;;  %v2201_v7 = vpack.c.bf16 %v894_v5, %v893_v4  ;;  %v896_v9 = vld [vmem:[#allocation5 + $0x48] sm:$0xff]  ;;  %v899_v10 = vld [vmem:[#allocation5 + $0x60] sm:$0xff]  ;;  %v897_v19 = vld [vmem:[#allocation5 + $0x50] sm:$0xff] }
  0x56   : > { %1990 = vmatmul.mubr.msk.f32.vlgmr.msra.gmra.mrb[2].mxu0 %vm302_vm1, %v264_v32  ;;  %v900_v12 = vld [vmem:[#allocation5 + $0x68] sm:$0xff]  ;;  %v2205_v13 = vpack.c.bf16 %v896_v9, %v895_v8  ;;  %v898_v20 = vld [vmem:[#allocation5 + $0x58] sm:$0xff]  ;;  %v901_v21 = vld [vmem:[#allocation5 + $0x70] sm:$0xff] }
  0x57   : > { %2001 = vmatmul.mubr.msk.f32.vlgmr.msra.gmra.mrb[2].mxu1 %vm302_vm1, %v265_v34  ;;  %2166 = vmatpush3.bf16.msra.mxu0 %v2165_v33  ;;  %v2213_v14 = vpack.c.bf16 %v900_v12, %v899_v10  ;;  %v902_v22 = vld [vmem:[#allocation5 + $0x78] sm:$0xff]  ;;  %v2209_v23 = vpack.c.bf16 %v898_v20, %v897_v19  ;;  %v903_v29 = vld [vmem:[#allocation5 + $0x80] sm:$0xff]  ;;  %v904_v30 = vld [vmem:[#allocation5 + $0x88] sm:$0xff] }
  0x58   : > { %2172 = vmatpush3.bf16.msra.mxu1 %v2171_v35  ;;  %2167 = vmatprep.subr.bf16.mxu0 %v2362_v3  ;;  %v2217_v24 = vpack.c.bf16 %v902_v22, %v901_v21  ;;  %v907_v31 = vld [vmem:[#allocation5 + $0xa0] sm:$0xff]  ;;  %v908_v32 = vld [vmem:[#allocation5 + $0xa8] sm:$0xff]  ;;  %v2221_v33 = vpack.c.bf16 %v904_v30, %v903_v29  ;;  %v905_v39 = vld [vmem:[#allocation5 + $0x90] sm:$0xff] }
  0x59   : > { %2173 = vmatprep.subr.bf16.mxu1 %v2362_v3  ;;  %2011 = vmatprep.mubr.msk.f32.mxu0 %vm2363_vm0, %v2364_v11  ;;  %v2229_v34 = vpack.c.bf16 %v908_v32, %v907_v31  ;;  %v910_v42 = vld [vmem:[#allocation5 + $0xb8] sm:$0xff]  ;;  %v912_v50 = vld [vmem:[#allocation5 + $0xc8] sm:$0xff]  ;;  %v915_v51 = vld [vmem:[#allocation5 + $0xe0] sm:$0xff] }
  0x5a   : > { %2022 = vmatprep.mubr.msk.f32.mxu1 %vm2363_vm0, %v2364_v11  ;;  %v916_v52 = vld [vmem:[#allocation5 + $0xe8] sm:$0xff]  ;;  %v918_v58 = vld [vmem:[#allocation5 + $0xf8] sm:$0xff] }
  0x5b   : > { %2169 = vmatpush3.bf16.msra.mxu0 %v2168_v40  ;;  %v906_v40 = vld [vmem:[#allocation5 + $0x98] sm:$0xff] }
  0x5c   : > { %2175 = vmatpush3.bf16.msra.mxu1 %v2174_v41  ;;  %2176 = vmatprep.subr.bf16.mxu0 %v2362_v3  ;;  %v909_v41 = vld [vmem:[#allocation5 + $0xb0] sm:$0xff]  ;;  %v2225_v43 = vpack.c.bf16 %v906_v40, %v905_v39 }
  0x5d   : > { %2182 = vmatprep.subr.bf16.mxu1 %v2362_v3  ;;  %v2233_v44 = vpack.c.bf16 %v910_v42, %v909_v41 }
  0x5e   : > { %2012 = vmatmul.mubr.msk.f32.vlgmr.msra.gmra.mrb[4].mxu0 %vm302_vm1, %v266_v46 }
  0x5f   : > { %2023 = vmatmul.mubr.msk.f32.vlgmr.msra.gmra.mrb[4].mxu1 %vm302_vm1, %v267_v48  ;;  %2178 = vmatpush3.bf16.msra.mxu0 %v2177_v47 }
  0x60   : > { %2184 = vmatpush3.bf16.msra.mxu1 %v2183_v49  ;;  %2179 = vmatprep.subr.bf16.mxu0 %v2362_v3  ;;  %v911_v49 = vld [vmem:[#allocation5 + $0xc0] sm:$0xff] }
  0x61   : > { %2185 = vmatprep.subr.bf16.mxu1 %v2362_v3  ;;  %2033 = vmatprep.mubr.msk.f32.mxu0 %vm2363_vm0, %v2364_v11  ;;  %v2237_v53 = vpack.c.bf16 %v912_v50, %v911_v49 }
  0x62   : > { %2044 = vmatprep.mubr.msk.f32.mxu1 %vm2363_vm0, %v2364_v11 }
  0x63   : > { %2181 = vmatpush3.bf16.msra.mxu0 %v2180_v54  ;;  %v2245_v54 = vpack.c.bf16 %v916_v52, %v915_v51 }
  0x64   : > { %2187 = vmatpush3.bf16.msra.mxu1 %v2186_v55  ;;  %2188 = vmatprep.subr.bf16.mxu0 %v2362_v3  ;;  %v913_v55 = vld [vmem:[#allocation5 + $0xd0] sm:$0xff] }
  0x65   : > { %2196 = vmatprep.subr.bf16.mxu1 %v2362_v3 }
  0x66   : > { %2034 = vmatmul.mubr.msk.f32.vlgmr.msra.gmra.mrb[6].mxu0 %vm302_vm1, %v268_v56  ;;  %v914_v56 = vld [vmem:[#allocation5 + $0xd8] sm:$0xff] }
  0x67   : > { %2045 = vmatmul.mubr.msk.f32.vlgmr.msra.gmra.mrb[6].mxu1 %vm302_vm1, %v269_v57  ;;  %2055 = vmatprep.mubr.msk.f32.mxu0 %vm2363_vm0, %v2364_v11  ;;  %v917_v57 = vld [vmem:[#allocation5 + $0xf0] sm:$0xff]  ;;  %v2241_v59 = vpack.c.bf16 %v914_v56, %v913_v55 }
  0x68   : > { %2066 = vmatprep.mubr.msk.f32.mxu1 %vm2363_vm0, %v2364_v11  ;;  %v2249_v60 = vpack.c.bf16 %v918_v58, %v917_v57 }
  0x6c   : > { %2191 = vmatpush3.bf16.xpose.msk.msra.mxu0 %vm2563_vm2, %v2189_v62 }
  0x6d   : > { %2199 = vmatpush3.bf16.xpose.msk.msra.mxu1 %vm2563_vm2, %v2197_v0  ;;  %2192 = vmatprep.subr.bf16.mxu0 %v2362_v3 }
  0x6e   : > { %2200 = vmatprep.subr.bf16.mxu1 %v2362_v3 }
  0x74   : > { %2195 = vmatpush3.bf16.xpose.msk.msra.mxu0 %vm2563_vm2, %v2193_v6 }
  0x75   : > { %2203 = vmatpush3.bf16.xpose.msk.msra.mxu1 %vm2563_vm2, %v2201_v7  ;;  %2204 = vmatprep.subr.bf16.mxu0 %v2362_v3 }
  0x76   : > { %2212 = vmatprep.subr.bf16.mxu1 %v2362_v3 }
 0x121   : > { %v372_v15 = vpop.f32.mrb[0].mxu0 }
 0x122   : > { %v445_v16 = vpop.f32.mrb[0].mxu1  ;;  %v1969_v17 = vpop.f32.mrb[1].mxu0  ;;  %2056 = vmatmul.mubr.msk.f32.vlgmr.msra.gmra.mrb[8].mxu0 %vm302_vm1, %v372_v15 }
 0x123   : > { %v1980_v18 = vpop.f32.mrb[1].mxu1  ;;  %2067 = vmatmul.mubr.msk.f32.vlgmr.msra.gmra.mrb[8].mxu1 %vm302_vm1, %v445_v16  ;;  %2207 = vmatpush3.bf16.xpose.msk.msra.mxu0 %vm2563_vm2, %v2205_v13 }
 0x124   : > { %2215 = vmatpush3.bf16.xpose.msk.msra.mxu1 %vm2563_vm2, %v2213_v14  ;;  %2208 = vmatprep.subr.bf16.mxu0 %v2362_v3 }
 0x125   : > { %2216 = vmatprep.subr.bf16.mxu1 %v2362_v3  ;;  %2077 = vmatprep.mubr.msk.f32.mxu0 %vm2363_vm0, %v2364_v11 }
 0x126   : > { %2088 = vmatprep.mubr.msk.f32.mxu1 %vm2363_vm0, %v2364_v11 }
 0x129   : > { %v518_v25 = vpop.f32.mrb[2].mxu0 }
 0x12a   : > { %v1991_v26 = vpop.f32.mrb[3].mxu0  ;;  %v591_v27 = vpop.f32.mrb[2].mxu1 }
 0x12b   : > { %2211 = vmatpush3.bf16.xpose.msk.msra.mxu0 %vm2563_vm2, %v2209_v23  ;;  %v2002_v28 = vpop.f32.mrb[3].mxu1 }
 0x12c   : > { %2219 = vmatpush3.bf16.xpose.msk.msra.mxu1 %vm2563_vm2, %v2217_v24  ;;  %2220 = vmatprep.subr.bf16.mxu0 %v2362_v3 }
 0x12d   : > { %2228 = vmatprep.subr.bf16.mxu1 %v2362_v3 }
 0x131   : > { %v664_v35 = vpop.f32.mrb[4].mxu0 }
 0x132   : > { %2078 = vmatmul.mubr.msk.f32.vlgmr.msra.gmra.mrb[10].mxu0 %vm302_vm1, %v518_v25  ;;  %v2013_v36 = vpop.f32.mrb[5].mxu0  ;;  %v737_v37 = vpop.f32.mrb[4].mxu1 }
 0x133   : > { %2089 = vmatmul.mubr.msk.f32.vlgmr.msra.gmra.mrb[10].mxu1 %vm302_vm1, %v591_v27  ;;  %2223 = vmatpush3.bf16.xpose.msk.msra.mxu0 %vm2563_vm2, %v2221_v33  ;;  %v2024_v38 = vpop.f32.mrb[5].mxu1 }
 0x134   : > { %2231 = vmatpush3.bf16.xpose.msk.msra.mxu1 %vm2563_vm2, %v2229_v34  ;;  %2224 = vmatprep.subr.bf16.mxu0 %v2362_v3 }
 0x135   : > { %2232 = vmatprep.subr.bf16.mxu1 %v2362_v3  ;;  %2099 = vmatprep.mubr.msk.f32.mxu0 %vm2363_vm0, %v2364_v11 }
 0x136   : > { %2110 = vmatprep.mubr.msk.f32.mxu1 %vm2363_vm0, %v2364_v11 }
 0x139   : > { %v810_v45 = vpop.f32.mrb[6].mxu0 }
 0x13a   : > { %v2035_v46 = vpop.f32.mrb[7].mxu0  ;;  %v883_v47 = vpop.f32.mrb[6].mxu1 }
 0x13b   : > { %2227 = vmatpush3.bf16.xpose.msk.msra.mxu0 %vm2563_vm2, %v2225_v43  ;;  %v2046_v48 = vpop.f32.mrb[7].mxu1 }
 0x13c   : > { %2235 = vmatpush3.bf16.xpose.msk.msra.mxu1 %vm2563_vm2, %v2233_v44  ;;  %2236 = vmatprep.subr.bf16.mxu0 %v2362_v3 }
 0x13d   : > { %2244 = vmatprep.subr.bf16.mxu1 %v2362_v3 }
 0x142   : > { %2100 = vmatmul.mubr.msk.f32.vlgmr.msra.gmra.mrb[12].mxu0 %vm302_vm1, %v664_v35 }
 0x143   : > { %2111 = vmatmul.mubr.msk.f32.vlgmr.msra.gmra.mrb[12].mxu1 %vm302_vm1, %v737_v37  ;;  %2239 = vmatpush3.bf16.xpose.msk.msra.mxu0 %vm2563_vm2, %v2237_v53 }
 0x144   : > { %2247 = vmatpush3.bf16.xpose.msk.msra.mxu1 %vm2563_vm2, %v2245_v54  ;;  %2240 = vmatprep.subr.bf16.mxu0 %v2362_v3 }
 0x145   : > { %2248 = vmatprep.subr.bf16.mxu1 %v2362_v3  ;;  %2121 = vmatprep.mubr.msk.f32.mxu0 %vm2363_vm0, %v2364_v11 }
 0x146   : > { %2132 = vmatprep.mubr.msk.f32.mxu1 %vm2363_vm0, %v2364_v11 }
 0x14b   : > { %2243 = vmatpush3.bf16.xpose.msk.msra.mxu0 %vm2563_vm2, %v2241_v59 }
 0x14c   : > { %2251 = vmatpush3.bf16.xpose.msk.msra.mxu1 %vm2563_vm2, %v2249_v60 }
 0x152   : > { %2122 = vmatmul.mubr.msk.f32.vlgmr.msra.gmra.mrb[14].mxu0 %vm302_vm1, %v810_v45 }
 0x153   : > { %2133 = vmatmul.mubr.msk.f32.vlgmr.msra.gmra.mrb[14].mxu1 %vm302_vm1, %v883_v47 }
 0x1f5   : > { %v1000_v3 = vpop.f32.mrb[8].mxu0 }
 0x1f6   : > { %v1085_v61 = vpop.f32.mrb[8].mxu1  ;;  %v2057_v62 = vpop.f32.mrb[9].mxu0 }
 0x1f7   : > { %v1607_v0 = vrot.slane %v1085_v61, 7  ;;  %v2068_v1 = vpop.f32.mrb[9].mxu1 }
 0x1f9   : > { %v1609_v2 = vsel %vm1608_vm3, %v1607_v0, %v1000_v3 }
 0x205   : > { %v1170_v11 = vpop.f32.mrb[10].mxu0 }
 0x206   : > { %v1610_v4 = vrot.slane %v1170_v11, 6  ;;  %v2079_v5 = vpop.f32.mrb[11].mxu0  ;;  %v1255_v6 = vpop.f32.mrb[10].mxu1 }
 0x207   : > { %v1613_v7 = vrot.slane %v1255_v6, 5  ;;  %v2090_v63 = vpop.f32.mrb[11].mxu1 }
 0x208   : > { %v1612_v8 = vsel %vm1611_vm4, %v1610_v4, %v1609_v2 }
 0x209   : > { %v1615_v9 = vsel %vm1614_vm5, %v1613_v7, %v1612_v8 }
 0x215   : > { %v1340_v10 = vpop.f32.mrb[12].mxu0 }
 0x216   : > { %v1616_v12 = vrot.slane %v1340_v10, 4  ;;  %v2101_v13 = vpop.f32.mrb[13].mxu0  ;;  %v1425_v14 = vpop.f32.mrb[12].mxu1 }
 0x217   : > { %v1619_v15 = vrot.slane %v1425_v14, 3  ;;  %v2112_v16 = vpop.f32.mrb[13].mxu1 }
 0x218   : > { %v1618_v17 = vsel %vm1617_vm6, %v1616_v12, %v1615_v9 }
 0x219   : > { %v1621_v18 = vsel %vm1620_vm7, %v1619_v15, %v1618_v17 }
 0x225   : > { %v1510_v19 = vpop.f32.mrb[14].mxu0 }
 0x226   : > { %v1622_v20 = vrot.slane %v1510_v19, 2  ;;  %v1595_v21 = vpop.f32.mrb[14].mxu1  ;;  %v2123_v22 = vpop.f32.mrb[15].mxu0 }
 0x227   : > { %v1625_v23 = vrot.slane %v1595_v21, 1  ;;  %v2134_v24 = vpop.f32.mrb[15].mxu1 }
 0x228   : > { %v1624_v25 = vsel %vm1623_vm8, %v1622_v20, %v1621_v18 }
 0x229   : > { %v1627_v26 = vsel %vm1626_vm9, %v1625_v23, %v1624_v25 }
 0x22a   : > { %1629 = vst.msk [vmem:[#allocation2] sm:$0xff] %vm302_vm1, %v1627_v26 }
 0x22b PF: > { %v1873_v28 = vld [vmem:[%s2482_s30] sm:$0xff]   ;;  %vm1642_vm10 = vcmask 64512   ;;  %vm1724_vm11 = vcmask 261120  }
 0x22c   : > { %v1874_v29 = vunpack.c.l.bf16 %v1873_v28  ;;  %v1875_v30 = vunpack.c.h.bf16 %v1873_v28  ;;  %v1867_v31 = vld [vmem:[%s2646_s3] ss:$0 sm:$0xff] }
 0x22e   : > { %2137 = vmatprep.mubr.msk.f32.mxu0 %vm1642_vm10, %v1874_v29 }
 0x231   : > { %v1634_v27 = vld [vmem:[#allocation2] sm:$0xff] }
 0x232   : > { %2135 = vmatprep.subr.mxu0 %v1634_v27 }
 0x233   : > { %2136 = vmatpush3.msra.mxu0 %v1634_v27 }
 0x234   : > { %2138 = vmatmul.mubr.msk.f32.vlgmr.msra.gmra.mrb[0].mxu0 %vm1642_vm10, %v1875_v30 }
 0x307   : > { %v2139_v32 = vpop.f32.mrb[0].mxu0 }
 0x308   : > { %v1715_v33 = vpop.f32.mrb[1].mxu0  ;;  %v1721_v35 = vadd.f32 %v2139_v32, %v1867_v31 }
 0x309   : > { %v1716_v34 = vadd.f32 %v1867_v31, %v1715_v33 }
 0x30a   : > { %1726 = vst.msk [vmem:[%s2487_s8 + $0x8] sm:$0xff] %vm1724_vm11, %v1721_v35 }
 0x30b   : > { %1725 = vst.msk [vmem:[%s2487_s8] sm:$0xff] %vm1724_vm11, %v1716_v34 }
 0x30c PF: > { %s17_s18 = sadd.s32 1, %s2356_s18  }
 0x30d   : > { %p14_p10 = scmp.ge.s32.totalorder %s17_s18, 6  }
 0x30f   :  { %16 = sbr.rel (!%p14_p10) target bundleno = 2 (0x2), region = 83 }
 0x316   :  { %1749 = vsyncpa [#allocation4], 1 }
 0x317   :  { %1751 = vsyncpa [#allocation4 + $0x1], 1 }
 0x318   :  { %1752 = vsyncpa [#allocation6], 1 }

</bundles_post_ra>
